<compile_context>
chip_gen: v7x
topology: tpu7x:2x2x1
jax: 0.10.0
libtpu: 0.0.40
codegen_flags: <defaults>
</compile_context>

<pallas_src>
import jax
import jax.numpy as jnp
from jax.experimental import pallas as pl
from jax.experimental.pallas import tpu as pltpu


def _resid_linear_kernel_acc_out(x_ref, w_ref, xres_ref, b_ref, o_ref):
    """float32-output variant: accumulate directly into the resident output block.

    x_ref    : (tm, tk)  matmul operand tile of x        (block index (i, k))
    w_ref    : (tn, tk)  weight tile, (dim_out, dim_in)  (block index (j, k))
    xres_ref : (tm, tn)  residual tile of x              (block index (i, j))
    b_ref    : (1,  tn)  bias tile                       (block index (0, j))
    o_ref    : (tm, tn)  float32 output tile, VMEM-resident across the K axis
    """
    k = pl.program_id(2)

    @pl.when(k == 0)
    def _():
        o_ref[...] = jnp.zeros_like(o_ref)

    # Contract on the last axis of BOTH operands: x @ W.T with no transpose anywhere.
    o_ref[...] += jax.lax.dot_general(
        x_ref[...], w_ref[...],
        dimension_numbers=(((1,), (1,)), ((), ())),
        preferred_element_type=jnp.float32,
    )

    @pl.when(k == pl.num_programs(2) - 1)
    def _():
        o_ref[...] += (b_ref[...].astype(jnp.float32)
                       + xres_ref[...].astype(jnp.float32))


def _resid_linear_kernel_scratch(x_ref, w_ref, xres_ref, b_ref, o_ref, acc_ref):
    """General variant (non-f32 output): f32 VMEM accumulator + cast-on-store epilogue."""
    k = pl.program_id(2)

    @pl.when(k == 0)
    def _():
        acc_ref[...] = jnp.zeros_like(acc_ref)

    acc_ref[...] += jax.lax.dot_general(
        x_ref[...], w_ref[...],
        dimension_numbers=(((1,), (1,)), ((), ())),
        preferred_element_type=jnp.float32,
    )

    @pl.when(k == pl.num_programs(2) - 1)
    def _():
        out = (acc_ref[...]
               + b_ref[...].astype(jnp.float32)
               + xres_ref[...].astype(jnp.float32))
        o_ref[...] = out.astype(o_ref.dtype)


def _round_up(v, m):
    return ((v + m - 1) // m) * m


def _tile_candidates(total, cap, steps=(256, 128)):
    """Divisor tile sizes of `total` that are <= cap, best-first.

    Preference: multiples of steps[0] (e.g. 256 => full MXU fill on v6e/v7x) before
    plain multiples of steps[-1], larger before smaller within each class.
    """
    fine = steps[-1]
    coarse = steps[0]
    cands = []
    t = (min(cap, total) // fine) * fine
    while t >= fine:
        if total % t == 0:
            cands.append(t)
        t -= fine
    if not cands:
        return [total]
    cands.sort(key=lambda v: (v % coarse != 0, -v))
    return cands


def _vmem_footprint(tm, tn, tk, mm_bytes, x_bytes, b_bytes, out_bytes, use_scratch):
    """Double-buffered VMEM working set for one grid step (bytes)."""
    fp = 2 * tm * tk * mm_bytes          # x matmul tiles
    fp += 2 * tn * tk * mm_bytes         # weight tiles
    fp += 2 * tm * tn * x_bytes          # residual tiles
    fp += 2 * tn * b_bytes               # bias tiles
    fp += 2 * tm * tn * out_bytes        # output tiles
    if use_scratch:
        fp += tm * tn * 4                # f32 accumulator scratch
    return fp


def resid_linear(x, weight, bias, *, mm_dtype=jnp.bfloat16,
                 tm_cap=512, tn_cap=512, tk_cap=2048,
                 vmem_budget_bytes=36 * 1024 * 1024):
    """out = x @ weight.T + bias + x   (matches nn.Linear(dim, dim)(x) + x).

    x: (batch, dim), weight: (dim_out, dim_in) = (dim, dim), bias: (dim,).

    Accuracy contract: matmul operands run in `mm_dtype` (bf16 by default, f32
    accumulation); bias/residual stay at input precision.  Pass weights already in
    `mm_dtype` (persistent bf16) to avoid a per-call HBM cast.  mm_dtype=None keeps
    full input precision through the MXU (correct, but multi-pass and much slower).
    """
    batch, dim = x.shape
    assert weight.shape == (dim, dim)
    assert bias.shape == (dim,)
    out_dtype = x.dtype
    if mm_dtype is None:
        mm_dtype = x.dtype

    mm_bytes = jnp.dtype(mm_dtype).itemsize
    x_bytes = jnp.dtype(x.dtype).itemsize
    b_bytes = jnp.dtype(bias.dtype).itemsize
    out_bytes = jnp.dtype(out_dtype).itemsize
    use_scratch = jnp.dtype(out_dtype) != jnp.dtype(jnp.float32)

    # --- tile / padding selection -------------------------------------------------
    # dim -> multiple of 128 (lane-dense stores, no masked vst); batch padded so the
    # chosen tm divides it exactly (maximizes tm => fewest weight re-streams).
    dp = _round_up(dim, 128)
    tm_cap = max(8, (tm_cap // 8) * 8)
    tm = min(tm_cap, _round_up(batch, 8))
    mp = _round_up(batch, tm)
    grid_m = mp // tm

    # If the whole batch is one M block, make sure the N axis has >=2 parallel blocks
    # (keeps v7x's second TensorCore busy); only possible when dp >= 256.
    tn_cap_eff = min(tn_cap, dp // 2) if (grid_m == 1 and dp >= 256) else tn_cap

    tk_cands = _tile_candidates(dp, tk_cap)
    tn_cands = _tile_candidates(dp, tn_cap_eff)
    tn, tk = tn_cands[-1], tk_cands[-1]
    done = False
    for tk_c in tk_cands:
        for tn_c in tn_cands:
            if _vmem_footprint(tm, tn_c, tk_c, mm_bytes, x_bytes, b_bytes,
                               out_bytes, use_scratch) <= vmem_budget_bytes:
                tn, tk = tn_c, tk_c
                done = True
                break
        if done:
            break

    fp = _vmem_footprint(tm, tn, tk, mm_bytes, x_bytes, b_bytes, out_bytes, use_scratch)
    # Raise the scoped-VMEM limit if needed, but stay well clear of v7x's 64 MiB.
    vmem_limit = int(min(48 * 1024 * 1024, max(32 * 1024 * 1024, 2 * fp)))

    # --- padding & dtype plumbing ---------------------------------------------------
    pad_m, pad_d = mp - batch, dp - dim
    x_p = jnp.pad(x, ((0, pad_m), (0, pad_d))) if (pad_m or pad_d) else x
    w_p = jnp.pad(weight, ((0, pad_d), (0, pad_d))) if pad_d else weight
    b_p = (jnp.pad(bias, (0, pad_d)) if pad_d else bias).reshape(1, dp)

    # Only cast if the caller didn't already hand us mm_dtype data (persistent bf16
    # weights avoid re-reading dim^2 * 4B of HBM every call).
    x_mm = x_p if x_p.dtype == jnp.dtype(mm_dtype) else x_p.astype(mm_dtype)
    w_mm = w_p if w_p.dtype == jnp.dtype(mm_dtype) else w_p.astype(mm_dtype)

    grid = (grid_m, dp // tn, dp // tk)
    grid_n = grid[1]

    # Advisory cost estimate (accounts for weight/x re-streaming across M/N blocks).
    bytes_accessed = (grid_m * dp * dp * mm_bytes        # weight streamed per M block
                      + grid_n * mp * dp * mm_bytes      # x matmul operand per N block
                      + mp * dp * x_bytes                # residual read
                      + dp * b_bytes                     # bias
                      + mp * dp * out_bytes)             # output write
    cost = pl.CostEstimate(flops=2 * mp * dp * dp + 2 * mp * dp,
                           transcendentals=0,
                           bytes_accessed=int(bytes_accessed))

    kernel = _resid_linear_kernel_scratch if use_scratch else _resid_linear_kernel_acc_out
    scratch_shapes = [pltpu.VMEM((tm, tn), jnp.float32)] if use_scratch else []

    out_p = pl.pallas_call(
        kernel,
        out_shape=jax.ShapeDtypeStruct((mp, dp), out_dtype),
        grid_spec=pltpu.PrefetchScalarGridSpec(
            num_scalar_prefetch=0,
            grid=grid,
            in_specs=[
                pl.BlockSpec((tm, tk), lambda i, j, k: (i, k)),   # x   (matmul operand)
                pl.BlockSpec((tn, tk), lambda i, j, k: (j, k)),   # W   (dim_out, dim_in)
                pl.BlockSpec((tm, tn), lambda i, j, k: (i, j)),   # x   (residual tile)
                pl.BlockSpec((1, tn),  lambda i, j, k: (0, j)),   # bias
            ],
            out_specs=pl.BlockSpec((tm, tn), lambda i, j, k: (i, j)),
            scratch_shapes=scratch_shapes,
        ),
        compiler_params=pltpu.CompilerParams(
            dimension_semantics=("parallel", "parallel", "arbitrary"),
            vmem_limit_bytes=vmem_limit,
        ),
        cost_estimate=cost,
    )(x_mm, w_mm, x_p, b_p)

    return out_p[:batch, :dim] if (pad_m or pad_d) else out_p


if __name__ == "__main__":
    # Small shapes consistent with forward(x: (batch, dim)).
    batch, dim = 8, 32

    key = jax.random.PRNGKey(0)
    kx, kw, kb = jax.random.split(key, 3)

    # init == 'normal' path: kaiming_normal_(fan_out, relu) => std = sqrt(2/dim);
    # bias ~ U(-1, 1).
    w_std = jnp.sqrt(jnp.float32(2.0) / dim)
    weight_f32 = w_std * jax.random.normal(kw, (dim, dim), jnp.float32)  # (dim_out, dim_in)
    bias = jax.random.uniform(kb, (dim,), jnp.float32, -1.0, 1.0)
    x = jax.random.normal(kx, (batch, dim), jnp.float32)

    # Persistent bf16 weights: cast ONCE at init (as the model would), so the kernel
    # wrapper never re-casts dim^2 * 4B of HBM per invocation.
    weight_bf16 = weight_f32.astype(jnp.bfloat16)

    out = resid_linear(x, weight_bf16, bias)
    jax.block_until_ready(out)
    assert out.shape == (batch, dim)
    assert out.dtype == x.dtype

    # Pure-JAX references: exact bf16-matmul path (tight) and full-f32 path (loose,
    # accounts for the bf16 operand rounding).
    ref_bf16 = (jnp.dot(x.astype(jnp.bfloat16), weight_bf16.T,
                        preferred_element_type=jnp.float32) + bias + x)
    ref_f32 = x @ weight_f32.T + bias + x
    assert jnp.allclose(out, ref_bf16, atol=1e-3, rtol=1e-3), "mismatch vs bf16 reference"
    assert jnp.allclose(out, ref_f32, atol=5e-2, rtol=5e-2), "mismatch vs f32 reference"

    print("KERNEL_OK")
</pallas_src>

<mosaic_0001>
module attributes {stable_mosaic.version = 11 : i64} {
  func.func @_resid_linear_kernel_acc_out(%arg0: i32, %arg1: i32, %arg2: i32, %arg3: memref<8x128xbf16, #tpu.memory_space<vmem>>, %arg4: memref<128x128xbf16, #tpu.memory_space<vmem>>, %arg5: memref<8x128xf32, #tpu.memory_space<vmem>>, %arg6: memref<1x128xf32, #tpu.memory_space<vmem>>, %arg7: memref<8x128xf32, #tpu.memory_space<vmem>>) attributes {dimension_semantics = [#tpu.dimension_semantics<parallel>, #tpu.dimension_semantics<parallel>, #tpu.dimension_semantics<arbitrary>], iteration_bounds = array<i64: 1, 1, 1>, scalar_prefetch = 0 : i64, scratch_operands = 0 : i64, tpu.core_type = #tpu.core_type<tc>, window_params = [{transform_indices = @transform_0, window_bounds = array<i64: 8, 128>}, {transform_indices = @transform_1, window_bounds = array<i64: 128, 128>}, {transform_indices = @transform_2, window_bounds = array<i64: 8, 128>}, {transform_indices = @transform_3, window_bounds = array<i64: 1, 128>}, {transform_indices = @transform_4, window_bounds = array<i64: 8, 128>}]} {
    %c0_i32 = arith.constant 0 : i32
    %0 = arith.cmpi eq, %arg2, %c0_i32 : i32
    %1 = arith.extui %0 : i1 to i32
    %c0_i32_0 = arith.constant 0 : i32
    %2 = arith.cmpi ne, %1, %c0_i32_0 : i32
    scf.if %2 {
      %cst_10 = arith.constant 0.000000e+00 : f32
      %12 = vector.broadcast %cst_10 : f32 to vector<8x128xf32>
      %c0_11 = arith.constant 0 : index
      %c0_12 = arith.constant 0 : index
      %13 = vector.load %arg7[%c0_11, %c0_12] : memref<8x128xf32, #tpu.memory_space<vmem>>, vector<8x128xf32>
      tpu.vector_store %arg7[%c0_11, %c0_12], %12 {strides = array<i32>} : memref<8x128xf32, #tpu.memory_space<vmem>>, vector<8x128xf32>,
    } else {
    }
    %c0 = arith.constant 0 : index
    %c0_1 = arith.constant 0 : index
    %3 = vector.load %arg7[%c0, %c0_1] : memref<8x128xf32, #tpu.memory_space<vmem>>, vector<8x128xf32>
    %c0_2 = arith.constant 0 : index
    %c0_3 = arith.constant 0 : index
    %4 = vector.load %arg3[%c0_2, %c0_3] : memref<8x128xbf16, #tpu.memory_space<vmem>>, vector<8x128xbf16>
    %c0_4 = arith.constant 0 : index
    %c0_5 = arith.constant 0 : index
    %5 = vector.load %arg4[%c0_4, %c0_5] : memref<128x128xbf16, #tpu.memory_space<vmem>>, vector<128x128xbf16>
    %cst = arith.constant dense<0.000000e+00> : vector<8x128xf32>
    %6 = tpu.matmul %4, %5, %cst {dimension_numbers = #tpu.dot_dimension_numbers<[1], [1], [0], [0], [0, 0, 1, 0], [], []>} : vector<8x128xbf16>, vector<128x128xbf16>, vector<8x128xf32> -> vector<8x128xf32>
    %7 = arith.addf %3, %6 : vector<8x128xf32>
    %c0_6 = arith.constant 0 : index
    %c0_7 = arith.constant 0 : index
    %8 = vector.load %arg7[%c0_6, %c0_7] : memref<8x128xf32, #tpu.memory_space<vmem>>, vector<8x128xf32>
    tpu.vector_store %arg7[%c0_6, %c0_7], %7 {strides = array<i32>} : memref<8x128xf32, #tpu.memory_space<vmem>>, vector<8x128xf32>,
    %c0_i32_8 = arith.constant 0 : i32
    %9 = arith.cmpi eq, %arg2, %c0_i32_8 : i32
    %10 = arith.extui %9 : i1 to i32
    %c0_i32_9 = arith.constant 0 : i32
    %11 = arith.cmpi ne, %10, %c0_i32_9 : i32
    scf.if %11 {
      %c0_10 = arith.constant 0 : index
      %c0_11 = arith.constant 0 : index
      %12 = vector.load %arg7[%c0_10, %c0_11] : memref<8x128xf32, #tpu.memory_space<vmem>>, vector<8x128xf32>
      %c0_12 = arith.constant 0 : index
      %c0_13 = arith.constant 0 : index
      %13 = vector.load %arg6[%c0_12, %c0_13] : memref<1x128xf32, #tpu.memory_space<vmem>>, vector<1x128xf32>
      %c0_14 = arith.constant 0 : index
      %c0_15 = arith.constant 0 : index
      %14 = vector.load %arg5[%c0_14, %c0_15] : memref<8x128xf32, #tpu.memory_space<vmem>>, vector<8x128xf32>
      %15 = vector.broadcast %13 : vector<1x128xf32> to vector<8x128xf32>
      %16 = arith.addf %15, %14 : vector<8x128xf32>
      %17 = arith.addf %12, %16 : vector<8x128xf32>
      %c0_16 = arith.constant 0 : index
      %c0_17 = arith.constant 0 : index
      %18 = vector.load %arg7[%c0_16, %c0_17] : memref<8x128xf32, #tpu.memory_space<vmem>>, vector<8x128xf32>
      tpu.vector_store %arg7[%c0_16, %c0_17], %17 {strides = array<i32>} : memref<8x128xf32, #tpu.memory_space<vmem>>, vector<8x128xf32>,
    } else {
    }
    return
  }
  func.func @transform_0(%arg0: i32, %arg1: i32, %arg2: i32) -> (i32, i32) {
    %c0_i32 = arith.constant 0 : i32
    return %arg0, %arg2 : i32, i32
  }
  func.func @transform_1(%arg0: i32, %arg1: i32, %arg2: i32) -> (i32, i32) {
    %c0_i32 = arith.constant 0 : i32
    return %arg1, %arg2 : i32, i32
  }
  func.func @transform_2(%arg0: i32, %arg1: i32, %arg2: i32) -> (i32, i32) {
    %c0_i32 = arith.constant 0 : i32
    return %arg0, %arg1 : i32, i32
  }
  func.func @transform_3(%arg0: i32, %arg1: i32, %arg2: i32) -> (i32, i32) {
    %c0_i32 = arith.constant 0 : i32
    %c0_i32_0 = arith.constant 0 : i32
    return %c0_i32, %arg1 : i32, i32
  }
  func.func @transform_4(%arg0: i32, %arg1: i32, %arg2: i32) -> (i32, i32) {
    %c0_i32 = arith.constant 0 : i32
    return %arg0, %arg1 : i32, i32
  }
}

</mosaic_0001>

<bundles_post_ra>
// kernel: tpu_custom_call.1
= control target key start
LH: loop header
LB: loop body
LE: loop exit
PB: predicated region body
PF: predicated region fallthrough
CT: control target
= control target key end

     0   :  { %9 = vsyncpa [#allocation3], 0  ;;  %s432_s0 = inlined_call_operand.hbm [shape: bf16[8,128], index: 0, kind: input, shape index: {}]   ;;  %s433_s1 = inlined_call_operand.hbm [shape: bf16[128,128], index: 1, kind: input, shape index: {}]   ;;  %s434_s2 = inlined_call_operand.hbm [shape: f32[8,128], index: 2, kind: input, shape index: {}]   ;;  %s435_s3 = inlined_call_operand.vmem [shape: f32[1,128], index: 3, kind: input, shape index: {}]   ;;  %s436_s4 = inlined_call_operand.hbm [shape: f32[8,128], index: 4, kind: output, shape index: {}]  }
   0x1   :  { %10 = vsyncpa [#allocation6], 0 }
   0x2   :  { %11 = vsyncpa [#allocation4], 0  ;;  %s348_s15 = smov [#allocation5]   ;;  %s254_s19 = scalar_lea.hbm %s433_s1, 1024 }
   0x3   :  { %s27_s16 = sshll.u32 %s348_s15, 4  ;;  %p255_p0 = scmp.ne.s32.totalorder %s433_s1, %s254_s19  ;;  %s28_s16 = int_to_ptr.vmem [resolvable:$true] %s27_s16 }
   0x4   :  { %p258_p1 = scmp.lt.u32.totalorder %s254_s19, %s433_s1 }
   0x6   :  { %p260_p2 = pnand %p258_p1, %p255_p0 }
   0x8   :  { %263 = shalt.err (!%p260_p2)
}
   0x9   :  { %s264_s24 = scalar_lea.vmem %s28_s16, 1024  ;;  %p269_p4 = scmp.lt.s32.totalorder %s28_s16, %s28_s16 }
   0xa   :  { %p265_p3 = scmp.ne.s32.totalorder %s28_s16, %s264_s24  ;;  %p270_p5 = scmp.lt.s32.totalorder %s264_s24, %s264_s24 }
   0xc   :  { %p271_p6 = por %p270_p5, %p269_p4 }
   0xe   :  { %p272_p7 = pnand %p271_p6, %p265_p3 }
  0x10   :  { %275 = shalt.err (!%p272_p7)
}
  0x11   :  { %s349_s25 = smov 64   ;;  %s350_s26 = smov 4  }
  0x12   :  { %33 = dma.hbm_to_vmem [thread:$0]  %s433_s1, 1024, %s28_s16, [#allocation6], %s349_s25, %s349_s25, %s350_s26  }
  0x13   :  { %s351_s29 = smov [#allocation2]   ;;  %s352_s5 = smov [#allocation7]  }
  0x14   :  { %s18_s30 = sshll.u32 %s351_s29, 4  ;;  %s40_s6 = sshll.u32 %s352_s5, 4  ;;  %s19_s30 = int_to_ptr.vmem [resolvable:$true] %s18_s30  ;;  %s41_s6 = int_to_ptr.vmem [resolvable:$true] %s40_s6 }
  0x15   :  { %s276_s9 = scalar_lea.hbm %s432_s0, 64 }
  0x16   :  { %p277_p8 = scmp.ne.s32.totalorder %s432_s0, %s276_s9  ;;  %p280_p9 = scmp.lt.u32.totalorder %s276_s9, %s432_s0 }
  0x18   :  { %p282_p10 = pnand %p280_p9, %p277_p8 }
  0x1a   :  { %285 = shalt.err (!%p282_p10)
}
  0x1b   :  { %s286_s1 = scalar_lea.vmem %s19_s30, 64  ;;  %p291_p12 = scmp.lt.s32.totalorder %s19_s30, %s19_s30 }
  0x1c   :  { %p287_p11 = scmp.ne.s32.totalorder %s19_s30, %s286_s1  ;;  %p292_p13 = scmp.lt.s32.totalorder %s286_s1, %s286_s1 }
  0x1e   :  { %p293_p0 = por %p292_p13, %p291_p12 }
  0x20   :  { %p294_p1 = pnand %p293_p0, %p287_p11 }
  0x22   :  { %297 = shalt.err (!%p294_p1)
}
  0x23   :  { %21 = dma.hbm_to_vmem [thread:$0]  %s432_s0, 64, %s19_s30, [#allocation3]  }
  0x24   :  { %s298_s18 = scalar_lea.hbm %s434_s2, 128 }
  0x25   :  { %p299_p2 = scmp.ne.s32.totalorder %s434_s2, %s298_s18  ;;  %p302_p3 = scmp.lt.u32.totalorder %s298_s18, %s434_s2 }
  0x27   :  { %p304_p4 = pnand %p302_p3, %p299_p2 }
  0x29   :  { %307 = shalt.err (!%p304_p4)
}
  0x2a   :  { %s308_s23 = scalar_lea.vmem %s41_s6, 128  ;;  %p313_p6 = scmp.lt.s32.totalorder %s41_s6, %s41_s6 }
  0x2b   :  { %p309_p5 = scmp.ne.s32.totalorder %s41_s6, %s308_s23  ;;  %p314_p7 = scmp.lt.s32.totalorder %s308_s23, %s308_s23 }
  0x2d   :  { %p315_p8 = por %p314_p7, %p313_p6 }
  0x2f   :  { %p316_p9 = pnand %p315_p8, %p309_p5 }
  0x31   :  { %319 = shalt.err (!%p316_p9)
}
  0x32   :  { %43 = dma.hbm_to_vmem [thread:$0]  %s434_s2, 128, %s41_s6, [#allocation6]  }
  0x33   :  { %342 = dma.done.wait [#allocation3], 64  }
  0x34   :  { %343 = vsyncadd [#allocation3], 4294967232 }
  0x35   :  { %344 = dma.done.wait [#allocation6], 1152  }
  0x36   :  { %345 = vsyncadd [#allocation6], 4294966144  ;;  %v353_v0 = vmov 0.0   ;;  %vm354_vm0 = vmmov 0   ;;  %v246_v1 = vld [vmem:[#allocation5] sm:$0xff]   ;;  %v247_v2 = vld [vmem:[#allocation5 + $0x8] sm:$0xff]  }
  0x37   :  { %218 = vmatprep.subr.bf16.mxu0 %v353_v0  ;;  %234 = vmatprep.mubr.msk.bf16.mxu0 %vm354_vm0, %v353_v0  ;;  %v248_v3 = vld [vmem:[#allocation5 + $0x10] sm:$0xff]   ;;  %v249_v4 = vld [vmem:[#allocation5 + $0x18] sm:$0xff]   ;;  %v250_v5 = vld [vmem:[#allocation5 + $0x20] sm:$0xff]   ;;  %s355_s26 = smov [#allocation8]  }
  0x38   :  { %219 = vmatpush3.bf16.xpose.msra.mxu0 %v246_v1  ;;  %v251_v6 = vld [vmem:[#allocation5 + $0x28] sm:$0xff]   ;;  %v252_v7 = vld [vmem:[#allocation5 + $0x30] sm:$0xff]   ;;  %v253_v8 = vld [vmem:[#allocation5 + $0x38] sm:$0xff]   ;;  %s190_s27 = sshll.u32 %s355_s26, 4  ;;  %s191_s27 = int_to_ptr.vmem [resolvable:$true] %s190_s27 }
  0x39   :  { %220 = vmatprep.subr.bf16.mxu0 %v353_v0  ;;  %v62_v9 = vld [vmem:[#allocation2] sm:$0xf]  ;;  %v174_v11 = vld [vmem:[#allocation7] sm:$0xff]  ;;  %s320_s28 = scalar_lea.vmem %s191_s27, 128  ;;  %p325_p11 = scmp.lt.s32.totalorder %s191_s27, %s191_s27 }
  0x3a   :  { %v208_v10 = vld [vmem:[%s435_s3] ss:$0 sm:$0xff]  ;;  %p321_p10 = scmp.ne.s32.totalorder %s191_s27, %s320_s28  ;;  %p326_p12 = scmp.lt.s32.totalorder %s320_s28, %s320_s28 }
  0x3b   :  { %v181_v12 = vadd.f32 %v208_v10, %v174_v11 }
  0x3c   :  { %p327_p13 = por %p326_p12, %p325_p11 }
  0x3e   :  { %p328_p0 = pnand %p327_p13, %p321_p10 }
  0x40   :  { %221 = vmatpush3.bf16.xpose.msra.mxu0 %v247_v2 }
  0x41   :  { %222 = vmatprep.subr.bf16.mxu0 %v353_v0 }
  0x48   :  { %223 = vmatpush3.bf16.xpose.msra.mxu0 %v248_v3 }
  0x49   :  { %224 = vmatprep.subr.bf16.mxu0 %v353_v0 }
  0x50   :  { %225 = vmatpush3.bf16.xpose.msra.mxu0 %v249_v4 }
  0x51   :  { %226 = vmatprep.subr.bf16.mxu0 %v353_v0 }
  0x58   :  { %227 = vmatpush3.bf16.xpose.msra.mxu0 %v250_v5 }
  0x59   :  { %228 = vmatprep.subr.bf16.mxu0 %v353_v0 }
  0x60   :  { %229 = vmatpush3.bf16.xpose.msra.mxu0 %v251_v6 }
  0x61   :  { %230 = vmatprep.subr.bf16.mxu0 %v353_v0 }
  0x68   :  { %231 = vmatpush3.bf16.xpose.msra.mxu0 %v252_v7 }
  0x69   :  { %232 = vmatprep.subr.bf16.mxu0 %v353_v0 }
  0x70   :  { %233 = vmatpush3.bf16.xpose.msra.mxu0 %v253_v8 }
  0x77   :  { %235 = vmatmul.mubr.bf16.vlgmr.msra.gmra.mrb[0].mxu0 %v62_v9 }
 0x14a   :  { %v161_v13 = vpop.f32.mrb[0].mxu0 }
 0x14b   :  { %v236_v14 = vpop.f32.mrb[1].mxu0  ;;  %v182_v17 = vadd.f32 %v181_v12, %v161_v13 }
 0x14c   :  { %v164_v15 = vpop.f32.mrb[2].mxu0 }
 0x14d   :  { %v237_v16 = vpop.f32.mrb[3].mxu0  ;;  %183 = vst [vmem:[#allocation8] sm:$0xff] %v182_v17 }
 0x14e   :  { %331 = shalt.err (!%p328_p0)
}
 0x14f   :  { %s332_s30 = scalar_lea.hbm %s436_s4, 128 }
 0x150   :  { %p333_p1 = scmp.ne.s32.totalorder %s436_s4, %s332_s30  ;;  %p336_p2 = scmp.lt.u32.totalorder %s332_s30, %s436_s4 }
 0x152   :  { %p338_p3 = pnand %p336_p2, %p333_p1 }
 0x154   :  { %341 = shalt.err (!%p338_p3)
}
 0x155   :  { %193 = dma.vmem_to_hbm [thread:$0]  %s191_s27, 128, %s436_s4, [#allocation4]  }
 0x156   :  { %346 = dma.done.wait [#allocation4], 128  }
 0x157   :  { %347 = vsyncadd [#allocation4], 4294967168 }
 0x158   :  { %197 = vsyncpa [#allocation3], 1 }
 0x159   :  { %198 = vsyncpa [#allocation6], 1 }
 0x15a   :  { %199 = vsyncpa [#allocation4], 1 }

</bundles_post_ra>
